<compile_context>
chip_gen: v5e
topology: v5e:2x2
jax: 0.10.0
libtpu: 0.0.40
codegen_flags: <defaults>
</compile_context>

<pallas_src>
import functools
import math

import jax
import jax.numpy as jnp
from jax.experimental import pallas as pl
from jax.experimental.pallas import tpu as pltpu

LANE = 128
SUBLANE_I8 = 32                    # int8 packs 4 rows/sublane -> batch tile mult of 32
VMEM_BUDGET = 48 * 1024 * 1024     # stay well under v7x's 64 MiB per-TensorCore VMEM
VMEM_LIMIT = 60 * 1024 * 1024      # raise scoped-VMEM limit (16/32 MiB default v5e/v6e)


def _round_up(n, m):
    return ((n + m - 1) // m) * m


def _pad2(a, rows, cols):
    pr, pc = rows - a.shape[0], cols - a.shape[1]
    if pr == 0 and pc == 0:
        return a
    return jnp.pad(a, ((0, pr), (0, pc)))


def plnn_kernel(x_ref,
                w1_ref, b1_ref,
                w2_ref, b2_ref,
                w3_ref, b3_ref,
                w4_ref, b4_ref,
                states_ref, logp_ref,
                *, h1p, h2p, h3p, d_out, d_out_p, compute_dtype):
    # x arrives un-padded (block last dim == D_in); cast only for the MXU.
    x = x_ref[...].astype(compute_dtype)

    # hidden1
    h1 = jnp.dot(x, w1_ref[...], preferred_element_type=jnp.float32) + b1_ref[...]
    states_ref[:, 0:h1p] = (h1 > 0.0).astype(states_ref.dtype)
    h1r = jnp.maximum(h1, 0.0).astype(compute_dtype)

    # hidden2
    h2 = jnp.dot(h1r, w2_ref[...], preferred_element_type=jnp.float32) + b2_ref[...]
    states_ref[:, h1p:h1p + h2p] = (h2 > 0.0).astype(states_ref.dtype)
    h2r = jnp.maximum(h2, 0.0).astype(compute_dtype)

    # hidden3
    h3 = jnp.dot(h2r, w3_ref[...], preferred_element_type=jnp.float32) + b3_ref[...]
    states_ref[:, h1p + h2p:h1p + h2p + h3p] = (h3 > 0.0).astype(states_ref.dtype)
    h3r = jnp.maximum(h3, 0.0).astype(compute_dtype)

    # output layer (mask padded logit columns only when padding exists)
    y = jnp.dot(h3r, w4_ref[...], preferred_element_type=jnp.float32) + b4_ref[...]
    if d_out != d_out_p:
        col = jax.lax.broadcasted_iota(jnp.int32, y.shape, 1)
        y = jnp.where(col < d_out, y, jnp.float32(-1e30))

    # numerically stable log_softmax along dim=1 (f32 throughout)
    m = jnp.max(y, axis=1, keepdims=True)
    shifted = y - m
    lse = jnp.log(jnp.sum(jnp.exp(shifted), axis=1, keepdims=True))
    logp_ref[...] = (shifted - lse).astype(logp_ref.dtype)


def prepare_plnn_params(params, matmul_dtype=jnp.bfloat16):
    """Pad & cast the weights ONCE.  Cache the returned dict across forwards."""
    D_in, H1 = params["w1"].shape
    H2 = params["w2"].shape[1]
    H3 = params["w3"].shape[1]
    D_out = params["w4"].shape[1]

    H1p = _round_up(H1, LANE)
    H2p = _round_up(H2, LANE)
    H3p = _round_up(H3, LANE)
    Dop = _round_up(D_out, LANE)

    wd = jnp.dtype(matmul_dtype)
    return dict(
        dims=dict(D_in=D_in, H1=H1, H2=H2, H3=H3, D_out=D_out,
                  H1p=H1p, H2p=H2p, H3p=H3p, Dop=Dop),
        compute_dtype=wd,
        # w1 keeps its un-padded K (== D_in) so x needs NO lane padding in HBM.
        w1=_pad2(params["w1"], D_in, H1p).astype(wd),
        b1=_pad2(params["b1"], 1, H1p).astype(jnp.float32),
        w2=_pad2(params["w2"], H1p, H2p).astype(wd),
        b2=_pad2(params["b2"], 1, H2p).astype(jnp.float32),
        w3=_pad2(params["w3"], H2p, H3p).astype(wd),
        b3=_pad2(params["b3"], 1, H3p).astype(jnp.float32),
        w4=_pad2(params["w4"], H3p, Dop).astype(wd),
        b4=_pad2(params["b4"], 1, Dop).astype(jnp.float32),
    )


def plnn_forward(x, prep, *, block_b=1024):
    """x: (B, D_in) float32.  prep: output of prepare_plnn_params (cached)."""
    B, D_in = x.shape
    d = prep["dims"]
    assert D_in == d["D_in"], "x feature dim does not match prepared params"
    H1, H2, H3, D_out = d["H1"], d["H2"], d["H3"], d["D_out"]
    H1p, H2p, H3p, Dop = d["H1p"], d["H2p"], d["H3p"], d["Dop"]
    Sp = H1p + H2p + H3p
    compute_dtype = prep["compute_dtype"]
    wbytes = compute_dtype.itemsize

    # Batch tile: multiple of 32 (int8 sublane packing), large enough to
    # amortize per-grid-step pipeline overhead, shrunk if VMEM would be tight.
    TB = _round_up(min(block_b, _round_up(B, SUBLANE_I8)), SUBLANE_I8)

    weight_bytes = (D_in * H1p + H1p * H2p + H2p * H3p + H3p * Dop) * wbytes \
                   + (H1p + H2p + H3p + Dop) * 4

    def vmem_estimate(tb):
        io = 2 * (tb * D_in * 4) + 2 * (tb * Sp) + 2 * (tb * Dop * 4)   # dbl-buffered tiles
        act = tb * (H1p + H2p + H3p + Dop) * (4 + wbytes)               # live activations
        return io + act + 2 * weight_bytes

    while TB > SUBLANE_I8 and vmem_estimate(TB) > VMEM_BUDGET:
        TB = max(SUBLANE_I8, (TB // 2) // SUBLANE_I8 * SUBLANE_I8)
    # TODO(synk): when the resident weights alone exceed the VMEM budget (very
    # large hidden dims), add a K/N-tiled grid axis with a pl.when-guarded
    # accumulator instead of assuming full weight residency.

    Bp = _round_up(B, TB)
    xp = x.astype(jnp.float32)
    if Bp != B:
        xp = jnp.pad(xp, ((0, Bp - B), (0, 0)))   # batch pad only; no lane pad of x

    grid = (Bp // TB,)
    row_map = lambda i: (i, 0)     # batch-tiled arrays
    const_map = lambda i: (0, 0)   # weights/biases stay resident across steps

    in_specs = [
        pl.BlockSpec((TB, D_in), row_map),
        pl.BlockSpec((D_in, H1p), const_map), pl.BlockSpec((1, H1p), const_map),
        pl.BlockSpec((H1p, H2p), const_map), pl.BlockSpec((1, H2p), const_map),
        pl.BlockSpec((H2p, H3p), const_map), pl.BlockSpec((1, H3p), const_map),
        pl.BlockSpec((H3p, Dop), const_map), pl.BlockSpec((1, Dop), const_map),
    ]
    out_specs = (
        pl.BlockSpec((TB, Sp), row_map),
        pl.BlockSpec((TB, Dop), row_map),
    )
    out_shapes = (
        jax.ShapeDtypeStruct((Bp, Sp), jnp.int8),      # activation bitmap (padded cols)
        jax.ShapeDtypeStruct((Bp, Dop), jnp.float32),  # log_softmax(y) (padded cols)
    )

    flops = 2 * Bp * (D_in * H1p + H1p * H2p + H2p * H3p + H3p * Dop)
    bytes_accessed = Bp * D_in * 4 + weight_bytes + Bp * Sp + Bp * Dop * 4
    cost = pl.CostEstimate(flops=flops, transcendentals=Bp * Dop,
                           bytes_accessed=bytes_accessed)

    kernel = functools.partial(
        plnn_kernel, h1p=H1p, h2p=H2p, h3p=H3p,
        d_out=D_out, d_out_p=Dop, compute_dtype=compute_dtype)

    states_p, logp_p = pl.pallas_call(
        kernel,
        grid=grid,
        in_specs=in_specs,
        out_specs=out_specs,
        out_shape=out_shapes,
        compiler_params=pltpu.CompilerParams(
            dimension_semantics=("parallel",),
            vmem_limit_bytes=VMEM_LIMIT),
        cost_estimate=cost,
    )(xp, prep["w1"], prep["b1"], prep["w2"], prep["b2"],
      prep["w3"], prep["b3"], prep["w4"], prep["b4"])

    # Epilogue: if the hidden sizes are already 128-multiples the valid state
    # columns are contiguous -> single cheap slice; otherwise a fused
    # slice+concat+cast.  Consumers that can take int8 directly should use
    # states_p to skip the f32 materialization entirely.
    if (H1, H2, H3) == (H1p, H2p, H3p):
        states = states_p[:B, :H1 + H2 + H3].astype(jnp.float32)
    else:
        states = jnp.concatenate(
            [states_p[:B, 0:H1],
             states_p[:B, H1p:H1p + H2],
             states_p[:B, H1p + H2p:H1p + H2p + H3]],
            axis=1).astype(jnp.float32)
    logp = logp_p[:B, :D_out]
    return states, logp


def init_linear_params(key, fan_in, fan_out):
    """Matches nn.Linear's U(-1/sqrt(fan_in), 1/sqrt(fan_in)); W stored (in, out)."""
    kw, kb = jax.random.split(key)
    bound = 1.0 / math.sqrt(fan_in)
    w = jax.random.uniform(kw, (fan_in, fan_out), jnp.float32, -bound, bound)
    b = jax.random.uniform(kb, (1, fan_out), jnp.float32, -bound, bound)
    return w, b


if __name__ == "__main__":
    # Small shapes consistent with PLNN(D_in, H1, H2, H3, D_out)
    B, D_in, H1, H2, H3, D_out = 8, 32, 32, 32, 32, 16

    key = jax.random.PRNGKey(0)
    kx, k1, k2, k3, k4 = jax.random.split(key, 5)

    x = jax.random.normal(kx, (B, D_in), jnp.float32)
    w1, b1 = init_linear_params(k1, D_in, H1)
    w2, b2 = init_linear_params(k2, H1, H2)
    w3, b3 = init_linear_params(k3, H2, H3)
    w4, b4 = init_linear_params(k4, H3, D_out)
    params = dict(w1=w1, b1=b1, w2=w2, b2=b2, w3=w3, b3=b3, w4=w4, b4=b4)

    # Pure-JAX reference (mirrors the PyTorch forward).
    def ref_forward(x, p):
        h1 = x @ p["w1"] + p["b1"]; h1r = jnp.maximum(h1, 0.0)
        h2 = h1r @ p["w2"] + p["b2"]; h2r = jnp.maximum(h2, 0.0)
        h3 = h2r @ p["w3"] + p["b3"]; h3r = jnp.maximum(h3, 0.0)
        y = h3r @ p["w4"] + p["b4"]
        lp = jax.nn.log_softmax(y, axis=1)
        st = jnp.concatenate([(h1 > 0), (h2 > 0), (h3 > 0)], axis=1).astype(jnp.float32)
        return st, lp

    states_ref, logp_ref = ref_forward(x, params)

    # 1) Exact-match check with f32 MXU operands.
    prep_f32 = prepare_plnn_params(params, matmul_dtype=jnp.float32)
    states32, logp32 = plnn_forward(x, prep_f32)
    jax.block_until_ready((states32, logp32))
    assert states32.shape == (B, H1 + H2 + H3)
    assert logp32.shape == (B, D_out)
    assert jnp.allclose(states32, states_ref)
    assert jnp.allclose(logp32, logp_ref, atol=1e-5, rtol=1e-5)

    # 2) Default bf16-operand fast path (v6e/v7x MXU native); f32 accumulation.
    prep_bf16 = prepare_plnn_params(params)  # matmul_dtype=jnp.bfloat16
    states16, logp16 = plnn_forward(x, prep_bf16)
    jax.block_until_ready((states16, logp16))
    assert states16.shape == (B, H1 + H2 + H3)
    assert logp16.shape == (B, D_out)
    assert bool(jnp.all(jnp.isfinite(logp16)))
    assert jnp.allclose(logp16, logp_ref, atol=1e-1, rtol=1e-1)

    print("KERNEL_OK")
</pallas_src>

<mosaic_0001>
module attributes {stable_mosaic.version = 11 : i64} {
  func.func @plnn_kernel(%arg0: i32, %arg1: memref<32x32xf32, #tpu.memory_space<vmem>>, %arg2: memref<32x128xf32, #tpu.memory_space<vmem>>, %arg3: memref<1x128xf32, #tpu.memory_space<vmem>>, %arg4: memref<128x128xf32, #tpu.memory_space<vmem>>, %arg5: memref<1x128xf32, #tpu.memory_space<vmem>>, %arg6: memref<128x128xf32, #tpu.memory_space<vmem>>, %arg7: memref<1x128xf32, #tpu.memory_space<vmem>>, %arg8: memref<128x128xf32, #tpu.memory_space<vmem>>, %arg9: memref<1x128xf32, #tpu.memory_space<vmem>>, %arg10: memref<32x384xi8, #tpu.memory_space<vmem>>, %arg11: memref<32x128xf32, #tpu.memory_space<vmem>>) attributes {dimension_semantics = [#tpu.dimension_semantics<parallel>], iteration_bounds = array<i64: 1>, scalar_prefetch = 0 : i64, scratch_operands = 0 : i64, tpu.core_type = #tpu.core_type<tc>, window_params = [{transform_indices = @transform_0, window_bounds = array<i64: 32, 32>}, {pipeline_mode = #tpu.pipeline_mode<synchronous>, transform_indices = @transform_1, window_bounds = array<i64: 32, 128>}, {pipeline_mode = #tpu.pipeline_mode<synchronous>, transform_indices = @transform_2, window_bounds = array<i64: 1, 128>}, {pipeline_mode = #tpu.pipeline_mode<synchronous>, transform_indices = @transform_3, window_bounds = array<i64: 128, 128>}, {pipeline_mode = #tpu.pipeline_mode<synchronous>, transform_indices = @transform_4, window_bounds = array<i64: 1, 128>}, {pipeline_mode = #tpu.pipeline_mode<synchronous>, transform_indices = @transform_5, window_bounds = array<i64: 128, 128>}, {pipeline_mode = #tpu.pipeline_mode<synchronous>, transform_indices = @transform_6, window_bounds = array<i64: 1, 128>}, {pipeline_mode = #tpu.pipeline_mode<synchronous>, transform_indices = @transform_7, window_bounds = array<i64: 128, 128>}, {pipeline_mode = #tpu.pipeline_mode<synchronous>, transform_indices = @transform_8, window_bounds = array<i64: 1, 128>}, {transform_indices = @transform_9, window_bounds = array<i64: 32, 384>}, {transform_indices = @transform_10, window_bounds = array<i64: 32, 128>}]} {
    %c0 = arith.constant 0 : index
    %c0_0 = arith.constant 0 : index
    %0 = vector.load %arg1[%c0, %c0_0] : memref<32x32xf32, #tpu.memory_space<vmem>>, vector<32x32xf32>
    %c0_1 = arith.constant 0 : index
    %c0_2 = arith.constant 0 : index
    %1 = vector.load %arg2[%c0_1, %c0_2] : memref<32x128xf32, #tpu.memory_space<vmem>>, vector<32x128xf32>
    %cst = arith.constant dense<0.000000e+00> : vector<32x128xf32>
    %2 = tpu.matmul %0, %1, %cst {dimension_numbers = #tpu.dot_dimension_numbers<[1], [0], [0], [1], [0, 0, 1, 1], [], []>} : vector<32x32xf32>, vector<32x128xf32>, vector<32x128xf32> -> vector<32x128xf32>
    %c0_3 = arith.constant 0 : index
    %c0_4 = arith.constant 0 : index
    %3 = vector.load %arg3[%c0_3, %c0_4] : memref<1x128xf32, #tpu.memory_space<vmem>>, vector<1x128xf32>
    %4 = vector.broadcast %3 : vector<1x128xf32> to vector<32x128xf32>
    %5 = arith.addf %2, %4 : vector<32x128xf32>
    %cst_5 = arith.constant 0.000000e+00 : f32
    %6 = vector.broadcast %cst_5 : f32 to vector<32x128xf32>
    %7 = arith.cmpf ogt, %5, %6 : vector<32x128xf32>
    %8 = arith.extui %7 : vector<32x128xi1> to vector<32x128xi8>
    %c0_6 = arith.constant 0 : index
    %c0_7 = arith.constant 0 : index
    %9 = vector.load %arg10[%c0_6, %c0_7] : memref<32x384xi8, #tpu.memory_space<vmem>>, vector<32x128xi8>
    tpu.vector_store %arg10[%c0_6, %c0_7], %8 {strides = array<i32>} : memref<32x384xi8, #tpu.memory_space<vmem>>, vector<32x128xi8>,
    %cst_8 = arith.constant 0.000000e+00 : f32
    %10 = vector.broadcast %cst_8 : f32 to vector<32x128xf32>
    %11 = arith.maximumf %5, %10 : vector<32x128xf32>
    %c0_9 = arith.constant 0 : index
    %c0_10 = arith.constant 0 : index
    %12 = vector.load %arg4[%c0_9, %c0_10] : memref<128x128xf32, #tpu.memory_space<vmem>>, vector<128x128xf32>
    %cst_11 = arith.constant dense<0.000000e+00> : vector<32x128xf32>
    %13 = tpu.matmul %11, %12, %cst_11 {dimension_numbers = #tpu.dot_dimension_numbers<[1], [0], [0], [1], [0, 0, 1, 1], [], []>} : vector<32x128xf32>, vector<128x128xf32>, vector<32x128xf32> -> vector<32x128xf32>
    %c0_12 = arith.constant 0 : index
    %c0_13 = arith.constant 0 : index
    %14 = vector.load %arg5[%c0_12, %c0_13] : memref<1x128xf32, #tpu.memory_space<vmem>>, vector<1x128xf32>
    %15 = vector.broadcast %14 : vector<1x128xf32> to vector<32x128xf32>
    %16 = arith.addf %13, %15 : vector<32x128xf32>
    %cst_14 = arith.constant 0.000000e+00 : f32
    %17 = vector.broadcast %cst_14 : f32 to vector<32x128xf32>
    %18 = arith.cmpf ogt, %16, %17 : vector<32x128xf32>
    %19 = arith.extui %18 : vector<32x128xi1> to vector<32x128xi8>
    %c0_15 = arith.constant 0 : index
    %c128 = arith.constant 128 : index
    %20 = vector.load %arg10[%c0_15, %c128] : memref<32x384xi8, #tpu.memory_space<vmem>>, vector<32x128xi8>
    tpu.vector_store %arg10[%c0_15, %c128], %19 {strides = array<i32>} : memref<32x384xi8, #tpu.memory_space<vmem>>, vector<32x128xi8>,
    %cst_16 = arith.constant 0.000000e+00 : f32
    %21 = vector.broadcast %cst_16 : f32 to vector<32x128xf32>
    %22 = arith.maximumf %16, %21 : vector<32x128xf32>
    %c0_17 = arith.constant 0 : index
    %c0_18 = arith.constant 0 : index
    %23 = vector.load %arg6[%c0_17, %c0_18] : memref<128x128xf32, #tpu.memory_space<vmem>>, vector<128x128xf32>
    %cst_19 = arith.constant dense<0.000000e+00> : vector<32x128xf32>
    %24 = tpu.matmul %22, %23, %cst_19 {dimension_numbers = #tpu.dot_dimension_numbers<[1], [0], [0], [1], [0, 0, 1, 1], [], []>} : vector<32x128xf32>, vector<128x128xf32>, vector<32x128xf32> -> vector<32x128xf32>
    %c0_20 = arith.constant 0 : index
    %c0_21 = arith.constant 0 : index
    %25 = vector.load %arg7[%c0_20, %c0_21] : memref<1x128xf32, #tpu.memory_space<vmem>>, vector<1x128xf32>
    %26 = vector.broadcast %25 : vector<1x128xf32> to vector<32x128xf32>
    %27 = arith.addf %24, %26 : vector<32x128xf32>
    %cst_22 = arith.constant 0.000000e+00 : f32
    %28 = vector.broadcast %cst_22 : f32 to vector<32x128xf32>
    %29 = arith.cmpf ogt, %27, %28 : vector<32x128xf32>
    %30 = arith.extui %29 : vector<32x128xi1> to vector<32x128xi8>
    %c0_23 = arith.constant 0 : index
    %c256 = arith.constant 256 : index
    %31 = vector.load %arg10[%c0_23, %c256] : memref<32x384xi8, #tpu.memory_space<vmem>>, vector<32x128xi8>
    tpu.vector_store %arg10[%c0_23, %c256], %30 {strides = array<i32>} : memref<32x384xi8, #tpu.memory_space<vmem>>, vector<32x128xi8>,
    %cst_24 = arith.constant 0.000000e+00 : f32
    %32 = vector.broadcast %cst_24 : f32 to vector<32x128xf32>
    %33 = arith.maximumf %27, %32 : vector<32x128xf32>
    %c0_25 = arith.constant 0 : index
    %c0_26 = arith.constant 0 : index
    %34 = vector.load %arg8[%c0_25, %c0_26] : memref<128x128xf32, #tpu.memory_space<vmem>>, vector<128x128xf32>
    %cst_27 = arith.constant dense<0.000000e+00> : vector<32x128xf32>
    %35 = tpu.matmul %33, %34, %cst_27 {dimension_numbers = #tpu.dot_dimension_numbers<[1], [0], [0], [1], [0, 0, 1, 1], [], []>} : vector<32x128xf32>, vector<128x128xf32>, vector<32x128xf32> -> vector<32x128xf32>
    %c0_28 = arith.constant 0 : index
    %c0_29 = arith.constant 0 : index
    %36 = vector.load %arg9[%c0_28, %c0_29] : memref<1x128xf32, #tpu.memory_space<vmem>>, vector<1x128xf32>
    %37 = vector.broadcast %36 : vector<1x128xf32> to vector<32x128xf32>
    %38 = arith.addf %35, %37 : vector<32x128xf32>
    %39 = tpu.iota {dimensions = array<i32: 1>} : vector<32x128xi32>
    %c16_i32 = arith.constant 16 : i32
    %40 = vector.broadcast %c16_i32 : i32 to vector<32x128xi32>
    %41 = arith.cmpi slt, %39, %40 : vector<32x128xi32>
    %cst_30 = arith.constant -1.000000e+30 : f32
    %42 = vector.broadcast %cst_30 : f32 to vector<32x128xf32>
    %43 = arith.select %41, %38, %42 : vector<32x128xi1>, vector<32x128xf32>
    %cst_31 = arith.constant dense<0xFF800000> : vector<32xf32>
    %44 = vector.multi_reduction <maximumf>, %43, %cst_31 [1] : vector<32x128xf32> to vector<32xf32>
    %45 = vector.shape_cast %44 : vector<32xf32> to vector<32x1xf32>
    %46 = vector.broadcast %45 : vector<32x1xf32> to vector<32x128xf32>
    %47 = arith.subf %43, %46 : vector<32x128xf32>
    %48 = math.exp %47 : vector<32x128xf32>
    %cst_32 = arith.constant dense<0.000000e+00> : vector<32xf32>
    %49 = vector.multi_reduction <add>, %48, %cst_32 [1] : vector<32x128xf32> to vector<32xf32>
    %50 = vector.shape_cast %49 : vector<32xf32> to vector<32x1xf32>
    %51 = math.log %50 : vector<32x1xf32>
    %52 = vector.broadcast %51 : vector<32x1xf32> to vector<32x128xf32>
    %53 = arith.subf %47, %52 : vector<32x128xf32>
    %c0_33 = arith.constant 0 : index
    %c0_34 = arith.constant 0 : index
    %54 = vector.load %arg11[%c0_33, %c0_34] : memref<32x128xf32, #tpu.memory_space<vmem>>, vector<32x128xf32>
    tpu.vector_store %arg11[%c0_33, %c0_34], %53 {strides = array<i32>} : memref<32x128xf32, #tpu.memory_space<vmem>>, vector<32x128xf32>,
    return
  }
  func.func @transform_0(%arg0: i32) -> (i32, i32) {
    %c0_i32 = arith.constant 0 : i32
    %c0_i32_0 = arith.constant 0 : i32
    return %arg0, %c0_i32 : i32, i32
  }
  func.func @transform_1(%arg0: i32) -> (i32, i32) {
    %c0_i32 = arith.constant 0 : i32
    %c0_i32_0 = arith.constant 0 : i32
    %c0_i32_1 = arith.constant 0 : i32
    return %c0_i32, %c0_i32_0 : i32, i32
  }
  func.func @transform_2(%arg0: i32) -> (i32, i32) {
    %c0_i32 = arith.constant 0 : i32
    %c0_i32_0 = arith.constant 0 : i32
    %c0_i32_1 = arith.constant 0 : i32
    return %c0_i32, %c0_i32_0 : i32, i32
  }
  func.func @transform_3(%arg0: i32) -> (i32, i32) {
    %c0_i32 = arith.constant 0 : i32
    %c0_i32_0 = arith.constant 0 : i32
    %c0_i32_1 = arith.constant 0 : i32
    return %c0_i32, %c0_i32_0 : i32, i32
  }
  func.func @transform_4(%arg0: i32) -> (i32, i32) {
    %c0_i32 = arith.constant 0 : i32
    %c0_i32_0 = arith.constant 0 : i32
    %c0_i32_1 = arith.constant 0 : i32
    return %c0_i32, %c0_i32_0 : i32, i32
  }
  func.func @transform_5(%arg0: i32) -> (i32, i32) {
    %c0_i32 = arith.constant 0 : i32
    %c0_i32_0 = arith.constant 0 : i32
    %c0_i32_1 = arith.constant 0 : i32
    return %c0_i32, %c0_i32_0 : i32, i32
  }
  func.func @transform_6(%arg0: i32) -> (i32, i32) {
    %c0_i32 = arith.constant 0 : i32
    %c0_i32_0 = arith.constant 0 : i32
    %c0_i32_1 = arith.constant 0 : i32
    return %c0_i32, %c0_i32_0 : i32, i32
  }
  func.func @transform_7(%arg0: i32) -> (i32, i32) {
    %c0_i32 = arith.constant 0 : i32
    %c0_i32_0 = arith.constant 0 : i32
    %c0_i32_1 = arith.constant 0 : i32
    return %c0_i32, %c0_i32_0 : i32, i32
  }
  func.func @transform_8(%arg0: i32) -> (i32, i32) {
    %c0_i32 = arith.constant 0 : i32
    %c0_i32_0 = arith.constant 0 : i32
    %c0_i32_1 = arith.constant 0 : i32
    return %c0_i32, %c0_i32_0 : i32, i32
  }
  func.func @transform_9(%arg0: i32) -> (i32, i32) {
    %c0_i32 = arith.constant 0 : i32
    %c0_i32_0 = arith.constant 0 : i32
    return %arg0, %c0_i32 : i32, i32
  }
  func.func @transform_10(%arg0: i32) -> (i32, i32) {
    %c0_i32 = arith.constant 0 : i32
    %c0_i32_0 = arith.constant 0 : i32
    return %arg0, %c0_i32 : i32, i32
  }
}

</mosaic_0001>

<bundles_post_ra>
// kernel: tpu_custom_call.1
= control target key start
LH: loop header
LB: loop body
LE: loop exit
PB: predicated region body
PF: predicated region fallthrough
CT: control target
= control target key end

     0   :  { %16 = vsyncpa [#allocation3], 0  ;;  %s794_s0 = inlined_call_operand.hbm [shape: f32[32,32], index: 0, kind: input, shape index: {}]   ;;  %s795_s1 = inlined_call_operand.hbm [shape: f32[32,128], index: 1, kind: input, shape index: {}]   ;;  %s796_s2 = inlined_call_operand.vmem [shape: f32[1,128], index: 2, kind: input, shape index: {}]   ;;  %s797_s3 = inlined_call_operand.hbm [shape: f32[128,128], index: 3, kind: input, shape index: {}]   ;;  %s798_s4 = inlined_call_operand.vmem [shape: f32[1,128], index: 4, kind: input, shape index: {}]   ;;  %s799_s5 = inlined_call_operand.hbm [shape: f32[128,128], index: 5, kind: input, shape index: {}]   ;;  %s800_s6 = inlined_call_operand.vmem [shape: f32[1,128], index: 6, kind: input, shape index: {}]   ;;  %s801_s7 = inlined_call_operand.hbm [shape: f32[128,128], index: 7, kind: input, shape index: {}]   ;;  %s802_s8 = inlined_call_operand.vmem [shape: f32[1,128], index: 8, kind: input, shape index: {}]   ;;  %s803_s9 = inlined_call_operand.hbm [shape: s8[32,384], index: 9, kind: output, shape index: {0}]   ;;  %s804_s10 = inlined_call_operand.hbm [shape: f32[32,128], index: 10, kind: output, shape index: {1}]  }
   0x1   :  { %17 = vsyncpa [#allocation6], 0 }
   0x2   :  { %18 = vsyncpa [#allocation9], 0 }
   0x3   :  { %19 = vsyncpa [#allocation4], 0 }
   0x4   :  { %20 = vsyncpa [#allocation13], 0  ;;  %s38_s15 = sshll.u32 %s795_s1, 4  ;;  %s665_s16 = smov [#allocation5]   ;;  %s39_s15 = int_to_ptr.hbm [resolvable:$true] %s38_s15 }
   0x5   :  { %s40_s17 = sshll.u32 %s665_s16, 4  ;;  %s68_s20 = sshll.u32 %s799_s5, 4  ;;  %s41_s17 = int_to_ptr.vmem [resolvable:$true] %s40_s17  ;;  %s69_s20 = int_to_ptr.hbm [resolvable:$true] %s68_s20 }
   0x6   :  { %s666_s21 = smov 128   ;;  %s667_s22 = smov 8  }
   0x7   :  { %46 = dma.hbm_to_vmem [thread:$0]  %s39_s15, 512, %s41_s17, [#allocation6], %s666_s21, %s666_s21, %s667_s22  }
   0x8   :  { %s668_s23 = smov [#allocation8]   ;;  %s25_s1 = sshll.u32 %s794_s0, 4  ;;  %s26_s1 = int_to_ptr.hbm [resolvable:$true] %s25_s1 }
   0x9   :  { %s70_s24 = sshll.u32 %s668_s23, 4  ;;  %s53_s28 = sshll.u32 %s797_s3, 4  ;;  %s71_s24 = int_to_ptr.vmem [resolvable:$true] %s70_s24  ;;  %s54_s28 = int_to_ptr.hbm [resolvable:$true] %s53_s28 }
   0xa   :  { %76 = dma.hbm_to_vmem [thread:$0]  %s69_s20, 2048, %s71_s24, [#allocation9], %s666_s21, %s666_s21, %s667_s22  }
   0xb   :  { %s669_s29 = smov [#allocation2]   ;;  %s670_s11 = smov [#allocation7]  }
   0xc   :  { %s27_s30 = sshll.u32 %s669_s29, 4  ;;  %s55_s0 = sshll.u32 %s670_s11, 4  ;;  %s28_s30 = int_to_ptr.vmem [resolvable:$true] %s27_s30  ;;  %s56_s0 = int_to_ptr.vmem [resolvable:$true] %s55_s0 }
   0xd   :  { %33 = dma.hbm_to_vmem [thread:$0]  %s26_s1, 512, %s28_s30, [#allocation3], %s666_s21, %s666_s21, %s667_s22  }
   0xe   :  { %s83_s14 = sshll.u32 %s801_s7, 4  ;;  %s671_s3 = smov [#allocation10]   ;;  %s84_s14 = int_to_ptr.hbm [resolvable:$true] %s83_s14 }
   0xf   :  { %61 = dma.hbm_to_vmem [thread:$0]  %s54_s28, 2048, %s56_s0, [#allocation6], %s666_s21, %s666_s21, %s667_s22  }
  0x10   :  { %s85_s15 = sshll.u32 %s671_s3, 4  ;;  %s86_s15 = int_to_ptr.vmem [resolvable:$true] %s85_s15 }
  0x11   :  { %91 = dma.hbm_to_vmem [thread:$0]  %s84_s14, 2048, %s86_s15, [#allocation9], %s666_s21, %s666_s21, %s667_s22  }
  0x12   :  { %655 = dma.done.wait [#allocation3], 512  }
  0x13   :  { %656 = vsyncadd [#allocation3], 4294966784 }
  0x14   :  { %657 = dma.done.wait [#allocation6], 2560  }
  0x15   :  { %658 = vsyncadd [#allocation6], 4294964736 }
  0x16   :  { %659 = dma.done.wait [#allocation9], 4096  }
  0x17   :  { %660 = vsyncadd [#allocation9], 4294963200  ;;  %v123_v0 = vld [vmem:[#allocation5 + $0x18] sm:$0xff]  ;;  %v122_v1 = vld [vmem:[#allocation5 + $0x10] sm:$0xff]  ;;  %vm128_vm0 = vcmask 261120   ;;  %v672_v50 = vmov 0  }
  0x18   :  { %153 = vmatpush.msra.mxu0 %v123_v0  ;;  %v121_v2 = vld [vmem:[#allocation5 + $0x8] sm:$0xff]  ;;  %v201_v3 = vld [vmem:[#allocation7 + $0x78] sm:$0xff]  ;;  %v200_v4 = vld [vmem:[#allocation7 + $0x70] sm:$0xff]  ;;  %s423_s25 = sshll.u32 %s803_s9, 4  ;;  %s674_s9 = smov [#allocation12]   ;;  %s424_s25 = int_to_ptr.hbm [resolvable:$true] %s423_s25 }
  0x19   :  { %206 = vmatpush.msra.mxu1 %v201_v3  ;;  %v120_v5 = vld [vmem:[#allocation5] sm:$0xff]  ;;  %v199_v6 = vld [vmem:[#allocation7 + $0x68] sm:$0xff]  ;;  %v197_v9 = vld [vmem:[#allocation7 + $0x58] sm:$0xff]  ;;  %s431_s26 = sshll.u32 %s674_s9, 4  ;;  %s433_s27 = sshll.u32 %s804_s10, 4  ;;  %s432_s26 = int_to_ptr.vmem [resolvable:$true] %s431_s26  ;;  %s434_s27 = int_to_ptr.hbm [resolvable:$true] %s433_s27 }
  0x1a   :  { %154 = vmatpush.msra.mxu0 %v122_v1  ;;  %v116_v7 = vld [vmem:[#allocation2] sm:$0xff]  ;;  %v196_v10 = vld [vmem:[#allocation7 + $0x50] sm:$0xff]  ;;  %v195_v11 = vld [vmem:[#allocation7 + $0x48] sm:$0xff] }
  0x1b   :  { %207 = vmatpush.msra.mxu1 %v200_v4  ;;  %v198_v8 = vld [vmem:[#allocation7 + $0x60] sm:$0xff]  ;;  %v117_v12 = vld [vmem:[#allocation2 + $0x8] sm:$0xff]  ;;  %v193_v14 = vld [vmem:[#allocation7 + $0x38] sm:$0xff] }
  0x1c   :  { %155 = vmatpush.msra.mxu0 %v121_v2  ;;  %v194_v13 = vld [vmem:[#allocation7 + $0x40] sm:$0xff]  ;;  %v192_v15 = vld [vmem:[#allocation7 + $0x30] sm:$0xff]  ;;  %v191_v16 = vld [vmem:[#allocation7 + $0x28] sm:$0xff] }
  0x1d   :  { %208 = vmatpush.msra.mxu1 %v199_v6  ;;  %v118_v17 = vld [vmem:[#allocation2 + $0x10] sm:$0xff]  ;;  %v190_v18 = vld [vmem:[#allocation7 + $0x20] sm:$0xff]  ;;  %v189_v19 = vld [vmem:[#allocation7 + $0x18] sm:$0xff] }
  0x1e   :  { %156 = vmatpush.msra.mxu0 %v120_v5  ;;  %v119_v20 = vld [vmem:[#allocation2 + $0x18] sm:$0xff]  ;;  %v188_v21 = vld [vmem:[#allocation7 + $0x10] sm:$0xff]  ;;  %v187_v22 = vld [vmem:[#allocation7 + $0x8] sm:$0xff] }
  0x1f   :  { %453 = vmatmul.msk.f32.vlgmr.msra.gmra.mxu0 %vm128_vm0, %v116_v7  ;;  %209 = vmatpush.msra.mxu1 %v198_v8  ;;  %v186_v23 = vld [vmem:[#allocation7] sm:$0xff]  ;;  %v266_v27 = vld [vmem:[#allocation8 + $0x78] sm:$0xff]  ;;  %v265_v28 = vld [vmem:[#allocation8 + $0x70] sm:$0xff] }
  0x20   :  { %v467_v24 = vld [vmem:[%s796_s2] ss:$0 sm:$0xff]  ;;  %271 = vmatpush.msra.mxu2 %v266_v27  ;;  %v264_v30 = vld [vmem:[#allocation8 + $0x68] sm:$0xff]  ;;  %v262_v33 = vld [vmem:[#allocation8 + $0x58] sm:$0xff] }
  0x21   :  { %210 = vmatpush.msra.mxu1 %v197_v9  ;;  %v263_v31 = vld [vmem:[#allocation8 + $0x60] sm:$0xff]  ;;  %v261_v35 = vld [vmem:[#allocation8 + $0x50] sm:$0xff]  ;;  %v260_v37 = vld [vmem:[#allocation8 + $0x48] sm:$0xff] }
  0x22   :  { %272 = vmatpush.msra.mxu2 %v265_v28  ;;  %v259_v38 = vld [vmem:[#allocation8 + $0x40] sm:$0xff]  ;;  %v258_v40 = vld [vmem:[#allocation8 + $0x38] sm:$0xff]  ;;  %v257_v42 = vld [vmem:[#allocation8 + $0x30] sm:$0xff] }
  0x23   :  { %211 = vmatpush.msra.mxu1 %v196_v10  ;;  %v256_v44 = vld [vmem:[#allocation8 + $0x28] sm:$0xff]  ;;  %v255_v45 = vld [vmem:[#allocation8 + $0x20] sm:$0xff]  ;;  %v254_v47 = vld [vmem:[#allocation8 + $0x18] sm:$0xff] }
  0x24   :  { %273 = vmatpush.msra.mxu2 %v264_v30  ;;  %v253_v55 = vld [vmem:[#allocation8 + $0x10] sm:$0xff]  ;;  %v252_v56 = vld [vmem:[#allocation8 + $0x8] sm:$0xff]  ;;  %v251_v57 = vld [vmem:[#allocation8] sm:$0xff] }
  0x25   :  { %212 = vmatpush.msra.mxu1 %v195_v11  ;;  %v468_v58 = vld [vmem:[%s798_s4] ss:$0 sm:$0xff]  ;;  %v331_v61 = vld [vmem:[#allocation10 + $0x78] sm:$0xff]  ;;  %v330_v62 = vld [vmem:[#allocation10 + $0x70] sm:$0xff] }
  0x26   :  { %274 = vmatpush.msra.mxu2 %v263_v31  ;;  %336 = vmatpush.msra.mxu3 %v331_v61  ;;  %v329_v0 = vld [vmem:[#allocation10 + $0x68] sm:$0xff]  ;;  %v328_v1 = vld [vmem:[#allocation10 + $0x60] sm:$0xff]  ;;  %v327_v3 = vld [vmem:[#allocation10 + $0x58] sm:$0xff] }
  0x27   :  { %454 = vmatmul.msk.f32.gmra.mxu0 %vm128_vm0, %v117_v12  ;;  %213 = vmatpush.msra.mxu1 %v194_v13  ;;  %v326_v5 = vld [vmem:[#allocation10 + $0x50] sm:$0xff]  ;;  %v325_v7 = vld [vmem:[#allocation10 + $0x48] sm:$0xff]  ;;  %v324_v8 = vld [vmem:[#allocation10 + $0x40] sm:$0xff] }
  0x28   :  { %275 = vmatpush.msra.mxu2 %v262_v33  ;;  %337 = vmatpush.msra.mxu3 %v330_v62  ;;  %v323_v10 = vld [vmem:[#allocation10 + $0x38] sm:$0xff]  ;;  %v322_v12 = vld [vmem:[#allocation10 + $0x30] sm:$0xff]  ;;  %v469_v27 = vld [vmem:[%s800_s6] ss:$0 sm:$0xff] }
  0x29   :  { %214 = vmatpush.msra.mxu1 %v193_v14  ;;  %v321_v14 = vld [vmem:[#allocation10 + $0x28] sm:$0xff] }
  0x2a   :  { %276 = vmatpush.msra.mxu2 %v261_v35  ;;  %338 = vmatpush.msra.mxu3 %v329_v0 }
  0x2b   :  { %215 = vmatpush.msra.mxu1 %v192_v15  ;;  %v320_v15 = vld [vmem:[#allocation10 + $0x20] sm:$0xff] }
  0x2c   :  { %277 = vmatpush.msra.mxu2 %v260_v37  ;;  %339 = vmatpush.msra.mxu3 %v328_v1 }
  0x2d   :  { %216 = vmatpush.msra.mxu1 %v191_v16 }
  0x2e   :  { %278 = vmatpush.msra.mxu2 %v259_v38  ;;  %340 = vmatpush.msra.mxu3 %v327_v3 }
  0x2f   :  { %455 = vmatmul.msk.f32.gmra.mxu0 %vm128_vm0, %v118_v17  ;;  %217 = vmatpush.msra.mxu1 %v190_v18  ;;  %v319_v17 = vld [vmem:[#allocation10 + $0x18] sm:$0xff] }
  0x30   :  { %279 = vmatpush.msra.mxu2 %v258_v40  ;;  %341 = vmatpush.msra.mxu3 %v326_v5 }
  0x31   :  { %218 = vmatpush.msra.mxu1 %v189_v19 }
  0x32   :  { %280 = vmatpush.msra.mxu2 %v257_v42  ;;  %342 = vmatpush.msra.mxu3 %v325_v7 }
  0x33   :  { %219 = vmatpush.msra.mxu1 %v188_v21 }
  0x34   :  { %281 = vmatpush.msra.mxu2 %v256_v44  ;;  %343 = vmatpush.msra.mxu3 %v324_v8  ;;  %v365_v44 = vlaneseq }
  0x35   :  { %220 = vmatpush.msra.mxu1 %v187_v22 }
  0x36   :  { %282 = vmatpush.msra.mxu2 %v255_v45  ;;  %344 = vmatpush.msra.mxu3 %v323_v10  ;;  %v366_v45 = vand.u32 127, %v365_v44 }
  0x37   :  { %456 = vmatmul.msk.f32.gmra.mxu0 %vm128_vm0, %v119_v20  ;;  %221 = vmatpush.msra.mxu1 %v186_v23 }
  0x38   :  { %283 = vmatpush.msra.mxu2 %v254_v47  ;;  %345 = vmatpush.msra.mxu3 %v322_v12 }
  0x3a   :  { %284 = vmatpush.msra.mxu2 %v253_v55  ;;  %346 = vmatpush.msra.mxu3 %v321_v14 }
  0x3c   :  { %285 = vmatpush.msra.mxu2 %v252_v56  ;;  %347 = vmatpush.msra.mxu3 %v320_v15 }
  0x3e   :  { %286 = vmatpush.msra.mxu2 %v251_v57  ;;  %348 = vmatpush.msra.mxu3 %v319_v17 }
  0x9c   :  { %v158_v25 = vpop.f32.mrf.mxu0 }
  0x9d   :  { %v159_v26 = vadd.f32 %v467_v24, %v158_v25  ;;  %v317_v25 = vld [vmem:[#allocation10 + $0x8] sm:$0xff] }
  0x9f   :  { %v182_v29 = vmax.f32 %v159_v26, 0.0  ;;  %vm170_vm2 = vcmp.gt.f32.partialorder %v159_v26, 0.0  ;;  %v316_v26 = vld [vmem:[#allocation10] sm:$0xff] }
  0xa1   :  { %222 = vmatmul.f32.vlgmr.msra.gmra.mxu1 %v182_v29 }
  0xa4   :  { %v161_v32 = vpop.f32.mrf.mxu0 }
  0xa5   :  { %v162_v34 = vadd.f32 %v467_v24, %v161_v32 }
  0xa7   :  { %v183_v36 = vmax.f32 %v162_v34, 0.0  ;;  %vm171_vm1 = vcmp.gt.f32.partialorder %v162_v34, 0.0 }
  0xa8   :  { %vm174_vm3 = vmpackc.low %vm171_vm1, %vm170_vm2 }
  0xa9   :  { %225 = vmatmul.f32.gmra.mxu1 %v183_v36  ;;  %v176_v51 = vsel %vm174_vm3, 16711935, %v672_v50 }
  0xac   :  { %v164_v39 = vpop.f32.mrf.mxu0 }
  0xad   :  { %v165_v41 = vadd.f32 %v467_v24, %v164_v39 }
  0xaf   :  { %v184_v43 = vmax.f32 %v165_v41, 0.0  ;;  %vm172_vm4 = vcmp.gt.f32.partialorder %v165_v41, 0.0 }
  0xb1   :  { %228 = vmatmul.f32.gmra.mxu1 %v184_v43 }
  0xb4   :  { %v167_v46 = vpop.f32.mrf.mxu0 }
  0xb5   :  { %v168_v48 = vadd.f32 %v467_v24, %v167_v46  ;;  %v318_v24 = vld [vmem:[#allocation10 + $0x10] sm:$0xff]  ;;  %v470_v46 = vld [vmem:[%s802_s8] ss:$0 sm:$0xff]  ;;  %s673_s8 = smov [#allocation11]  }
  0xb6   :  { %349 = vmatpush.msra.mxu3 %v318_v24  ;;  %s421_s20 = sshll.u32 %s673_s8, 4  ;;  %s422_s20 = int_to_ptr.vmem [resolvable:$true] %s421_s20 }
  0xb7   :  { %vm173_vm5 = vcmp.gt.f32.partialorder %v168_v48, 0.0  ;;  %v185_v49 = vmax.f32 %v168_v48, 0.0 }
  0xb8   :  { %vm175_vm6 = vmpackc.low %vm173_vm5, %vm172_vm4  ;;  %350 = vmatpush.msra.mxu3 %v317_v25 }
  0xb9   :  { %v177_v52 = vsel %vm175_vm6, 16711935, %v672_v50  ;;  %231 = vmatmul.f32.gmra.mxu1 %v185_v49  ;;  %vm367_vm6 = vcmp.lt.s32.totalorder %v366_v45, 16 }
  0xba   :  { %v178_v53 = vpack.c.b8 %v177_v52, %v176_v51  ;;  %351 = vmatpush.msra.mxu3 %v316_v26 }
  0xbc   :  { %vm179_vm7 = vnez %v178_v53 }
  0xbd   :  { %v180_v54 = vsel %vm179_vm7, 16843009, %v672_v50 }
  0xbe   :  { %181 = vst [vmem:[#allocation11] sm:$0xff] %v180_v54 }
 0x11e   :  { %v223_v59 = vpop.f32.mrf.mxu1 }
 0x11f   :  { %v224_v60 = vadd.f32 %v468_v58, %v223_v59 }
 0x121   :  { %v247_v63 = vmax.f32 %v224_v60, 0.0  ;;  %vm235_vm9 = vcmp.gt.f32.partialorder %v224_v60, 0.0 }
 0x123   :  { %287 = vmatmul.f32.vlgmr.msra.gmra.mxu2 %v247_v63 }
 0x126   :  { %v226_v2 = vpop.f32.mrf.mxu1 }
 0x127   :  { %v227_v4 = vadd.f32 %v468_v58, %v226_v2 }
 0x129   :  { %v248_v6 = vmax.f32 %v227_v4, 0.0  ;;  %vm236_vm8 = vcmp.gt.f32.partialorder %v227_v4, 0.0 }
 0x12a   :  { %vm239_vm10 = vmpackc.low %vm236_vm8, %vm235_vm9 }
 0x12b   :  { %290 = vmatmul.f32.gmra.mxu2 %v248_v6  ;;  %v241_v20 = vsel %vm239_vm10, 16711935, %v672_v50 }
 0x12e   :  { %v229_v9 = vpop.f32.mrf.mxu1 }
 0x12f   :  { %v230_v11 = vadd.f32 %v468_v58, %v229_v9 }
 0x131   :  { %v249_v13 = vmax.f32 %v230_v11, 0.0  ;;  %vm237_vm11 = vcmp.gt.f32.partialorder %v230_v11, 0.0 }
 0x133   :  { %293 = vmatmul.f32.gmra.mxu2 %v249_v13 }
 0x136   :  { %v232_v16 = vpop.f32.mrf.mxu1 }
 0x137   :  { %v233_v18 = vadd.f32 %v468_v58, %v232_v16 }
 0x139   :  { %vm238_vm12 = vcmp.gt.f32.partialorder %v233_v18, 0.0  ;;  %v250_v19 = vmax.f32 %v233_v18, 0.0 }
 0x13a   :  { %vm240_vm13 = vmpackc.low %vm238_vm12, %vm237_vm11 }
 0x13b   :  { %v242_v21 = vsel %vm240_vm13, 16711935, %v672_v50  ;;  %296 = vmatmul.f32.gmra.mxu2 %v250_v19 }
 0x13c   :  { %v243_v22 = vpack.c.b8 %v242_v21, %v241_v20 }
 0x13e   :  { %vm244_vm14 = vnez %v243_v22 }
 0x13f   :  { %v245_v23 = vsel %vm244_vm14, 16843009, %v672_v50 }
 0x140   :  { %246 = vst [vmem:[#allocation11 + $0x8] sm:$0xff] %v245_v23 }
 0x1a6   :  { %v288_v28 = vpop.f32.mrf.mxu2 }
 0x1a7   :  { %v289_v29 = vadd.f32 %v469_v27, %v288_v28 }
 0x1a9   :  { %v312_v30 = vmax.f32 %v289_v29, 0.0  ;;  %vm300_vm0 = vcmp.gt.f32.partialorder %v289_v29, 0.0 }
 0x1ab   :  { %352 = vmatmul.f32.vlgmr.msra.gmra.mxu3 %v312_v30 }
 0x1ae   :  { %v291_v31 = vpop.f32.mrf.mxu2 }
 0x1af   :  { %v292_v32 = vadd.f32 %v469_v27, %v291_v31 }
 0x1b1   :  { %v313_v33 = vmax.f32 %v292_v32, 0.0  ;;  %vm301_vm15 = vcmp.gt.f32.partialorder %v292_v32, 0.0 }
 0x1b2   :  { %vm304_vm1 = vmpackc.low %vm301_vm15, %vm300_vm0 }
 0x1b3   :  { %355 = vmatmul.f32.gmra.mxu3 %v313_v33  ;;  %v306_v40 = vsel %vm304_vm1, 16711935, %v672_v50 }
 0x1b6   :  { %v294_v34 = vpop.f32.mrf.mxu2 }
 0x1b7   :  { %v295_v35 = vadd.f32 %v469_v27, %v294_v34 }
 0x1b9   :  { %v314_v36 = vmax.f32 %v295_v35, 0.0  ;;  %vm302_vm2 = vcmp.gt.f32.partialorder %v295_v35, 0.0 }
 0x1bb   :  { %358 = vmatmul.f32.gmra.mxu3 %v314_v36 }
 0x1be   :  { %v297_v37 = vpop.f32.mrf.mxu2 }
 0x1bf   :  { %v298_v38 = vadd.f32 %v469_v27, %v297_v37 }
 0x1c1   :  { %vm303_vm3 = vcmp.gt.f32.partialorder %v298_v38, 0.0  ;;  %v315_v39 = vmax.f32 %v298_v38, 0.0 }
 0x1c2   :  { %vm305_vm4 = vmpackc.low %vm303_vm3, %vm302_vm2 }
 0x1c3   :  { %v307_v41 = vsel %vm305_vm4, 16711935, %v672_v50  ;;  %361 = vmatmul.f32.gmra.mxu3 %v315_v39 }
 0x1c4   :  { %v308_v42 = vpack.c.b8 %v307_v41, %v306_v40 }
 0x1c6   :  { %vm309_vm5 = vnez %v308_v42 }
 0x1c7   :  { %v310_v43 = vsel %vm309_vm5, 16843009, %v672_v50 }
 0x1c8   :  { %311 = vst [vmem:[#allocation11 + $0x10] sm:$0xff] %v310_v43 }
 0x1c9   :  { %426 = dma.vmem_to_hbm [thread:$0]  %s422_s20, 384, %s424_s25, [#allocation4]  }
 0x22e   :  { %v353_v47 = vpop.f32.mrf.mxu3 }
 0x22f   :  { %v354_v48 = vadd.f32 %v470_v46, %v353_v47 }
 0x231   :  { %v368_v49 = vsel %vm367_vm6, %v354_v48, -1e+30 }
 0x232   :  { %372 = vmax.xlane.f32.xlu0 %v368_v49 }
 0x236   :  { %v356_v51 = vpop.f32.mrf.mxu3 }
 0x237   :  { %v357_v52 = vadd.f32 %v470_v46, %v356_v51 }
 0x239   :  { %v369_v53 = vsel %vm367_vm6, %v357_v52, -1e+30 }
 0x23a   :  { %374 = vmax.xlane.f32.xlu0 %v369_v53 }
 0x23e   :  { %v359_v54 = vpop.f32.mrf.mxu3 }
 0x23f   :  { %v360_v55 = vadd.f32 %v470_v46, %v359_v54 }
 0x241   :  { %v370_v56 = vsel %vm367_vm6, %v360_v55, -1e+30 }
 0x242   :  { %376 = vmax.xlane.f32.xlu1 %v370_v56 }
 0x246   :  { %v362_v50 = vpop.f32.mrf.mxu3 }
 0x247   :  { %v363_v57 = vadd.f32 %v470_v46, %v362_v50 }
 0x249   :  { %v371_v58 = vsel %vm367_vm6, %v363_v57, -1e+30 }
 0x24a   :  { %378 = vmax.xlane.f32.xlu1 %v371_v58 }
 0x2a5   :  { %v373_v59 = vpop.xlane.xlu0 %372 }
 0x2a6   :  { %v380_v60 = vsub.f32 %v368_v49, %v373_v59 }
 0x2a8   :  { %v384_v61 = vmul.f32 1.442695, %v380_v60 }
 0x2aa   :  { %471 = vpow2.f32 %v384_v61 }
 0x2ad   :  { %v375_v62 = vpop.xlane.xlu0 %374 }
 0x2ae   :  { %v381_v63 = vsub.f32 %v369_v53, %v375_v62 }
 0x2b0   :  { %v472_v0 = vpop.eup %471  ;;  %v386_v1 = vmul.f32 1.442695, %v381_v63 }
 0x2b1   :  { %392 = vadd.xlane.f32.xlu2 %v472_v0 }
 0x2b2   :  { %473 = vpow2.f32 %v386_v1 }
 0x2b5   :  { %v377_v2 = vpop.xlane.xlu1 %376 }
 0x2b6   :  { %v382_v3 = vsub.f32 %v370_v56, %v377_v2 }
 0x2b8   :  { %v474_v4 = vpop.eup %473  ;;  %v388_v5 = vmul.f32 1.442695, %v382_v3 }
 0x2b9   :  { %394 = vadd.xlane.f32.xlu2 %v474_v4 }
 0x2ba   :  { %475 = vpow2.f32 %v388_v5 }
 0x2bd   :  { %v379_v6 = vpop.xlane.xlu1 %378 }
 0x2be   :  { %v383_v7 = vsub.f32 %v371_v58, %v379_v6 }
 0x2c0   :  { %v476_v8 = vpop.eup %475  ;;  %v390_v9 = vmul.f32 1.442695, %v383_v7 }
 0x2c1   :  { %396 = vadd.xlane.f32.xlu0 %v476_v8 }
 0x2c2   :  { %477 = vpow2.f32 %v390_v9 }
 0x2c8   :  { %v478_v10 = vpop.eup %477 }
 0x2c9   :  { %398 = vadd.xlane.f32.xlu1 %v478_v10 }
 0x324   :  { %v393_v11 = vpop.xlane.xlu2 %392 }
 0x325   :  { %479 = vlog2.f32 %v393_v11 }
 0x32b   :  { %v480_v12 = vpop.eup %479 }
 0x32c   :  { %v401_v13 = vmul.f32 0.6931472, %v480_v12  ;;  %v395_v14 = vpop.xlane.xlu2 %394 }
 0x32d   :  { %481 = vlog2.f32 %v395_v14 }
 0x32e   :  { %v408_v15 = vsub.f32 %v380_v60, %v401_v13 }
 0x330   :  { %412 = vst [vmem:[#allocation12] sm:$0xff] %v408_v15 }
 0x333   :  { %v482_v16 = vpop.eup %481 }
 0x334   :  { %v403_v17 = vmul.f32 0.6931472, %v482_v16  ;;  %v397_v18 = vpop.xlane.xlu0 %396 }
 0x335   :  { %483 = vlog2.f32 %v397_v18 }
 0x336   :  { %v409_v19 = vsub.f32 %v381_v63, %v403_v17 }
 0x338   :  { %413 = vst [vmem:[#allocation12 + $0x8] sm:$0xff] %v409_v19 }
 0x33b   :  { %v484_v20 = vpop.eup %483 }
 0x33c   :  { %v405_v21 = vmul.f32 0.6931472, %v484_v20  ;;  %v399_v22 = vpop.xlane.xlu1 %398 }
 0x33d   :  { %485 = vlog2.f32 %v399_v22 }
 0x33e   :  { %v410_v23 = vsub.f32 %v382_v3, %v405_v21 }
 0x340   :  { %414 = vst [vmem:[#allocation12 + $0x10] sm:$0xff] %v410_v23 }
 0x343   :  { %v486_v24 = vpop.eup %485 }
 0x344   :  { %v407_v25 = vmul.f32 0.6931472, %v486_v24 }
 0x346   :  { %v411_v26 = vsub.f32 %v383_v7, %v407_v25 }
 0x348   :  { %415 = vst [vmem:[#allocation12 + $0x18] sm:$0xff] %v411_v26 }
 0x349   :  { %439 = dma.vmem_to_hbm [thread:$0]  %s432_s26, 512, %s434_s27, [#allocation13], %s666_s21, %s666_s21, %s667_s22  }
 0x34a   :  { %661 = dma.done.wait [#allocation4], 384  }
 0x34b   :  { %662 = vsyncadd [#allocation4], 4294966912 }
 0x34c   :  { %663 = dma.done.wait [#allocation13], 512  }
 0x34d   :  { %664 = vsyncadd [#allocation13], 4294966784 }
 0x34e   :  { %448 = vsyncpa [#allocation3], 1 }
 0x34f   :  { %449 = vsyncpa [#allocation6], 1 }
 0x350   :  { %450 = vsyncpa [#allocation9], 1 }
 0x351   :  { %451 = vsyncpa [#allocation4], 1 }
 0x352   :  { %452 = vsyncpa [#allocation13], 1 }

</bundles_post_ra>
